<compile_context>
chip_gen: v7x
topology: tpu7x:2x2x1
jax: 0.10.0
libtpu: 0.0.40
codegen_flags: <defaults>
</compile_context>

<pallas_src>
import jax
import jax.numpy as jnp
from jax.experimental import pallas as pl
from jax.experimental.pallas import tpu as pltpu

OBS_DIM = 4
HIDDEN = 128
N_ACT = 2
OUT_PAD = 128  # fc3 padded to 128 columns for a lane-dense output store


def _round_up(n, m):
    return (n + m - 1) // m * m


def qnet_kernel(x_ref, w1_ref, b1_ref, w2_ref, b2_ref, w3_ref, b3_ref, out_ref):
    # fc1 (K=4): not worth an MXU pass -- 4 broadcast FMAs on the VPU.
    x = x_ref[...]                       # (tb, 4)   f32
    w1 = w1_ref[...]                     # (4, 128)  f32
    h1 = (b1_ref[...]
          + x[:, 0:1] * w1[0:1, :]
          + x[:, 1:2] * w1[1:2, :]
          + x[:, 2:3] * w1[2:3, :]
          + x[:, 3:4] * w1[3:4, :])
    h1 = jnp.maximum(h1, 0.0)            # (tb, 128) f32

    # fc2: bf16 MXU inputs, f32 accumulate, f32 epilogue.
    h2 = jnp.dot(h1.astype(jnp.bfloat16), w2_ref[...],
                 preferred_element_type=jnp.float32)
    h2 = jnp.maximum(h2 + b2_ref[...], 0.0)

    # fc3: weights zero-padded to 128 output columns -> unmasked lane-dense store.
    out = jnp.dot(h2.astype(jnp.bfloat16), w3_ref[...],
                  preferred_element_type=jnp.float32)
    out_ref[...] = out + b3_ref[...]     # (tb, 128) f32


def qnet_forward(x, params, *, tile_b=1024):
    """x: (B, 4) float32.  Returns (B, 2) float32 Q-values."""
    B = x.shape[0]
    tb = min(tile_b, _round_up(B, 8))          # sublane-aligned batch tile
    Bp = _round_up(B, tb)
    if Bp != B:
        x = jnp.pad(x, ((0, Bp - B), (0, 0)))

    w1, b1 = params["w1"], params["b1"]
    w2, b2 = params["w2"], params["b2"]
    w3, b3 = params["w3"], params["b3"]

    # Weights/biases: full-array block, same block index every grid step
    # -> stays resident in VMEM, DMA'd once.
    resident = lambda a: pl.BlockSpec(a.shape, lambda i: (0,) * a.ndim)

    out = pl.pallas_call(
        qnet_kernel,
        out_shape=jax.ShapeDtypeStruct((Bp, OUT_PAD), jnp.float32),
        grid=(Bp // tb,),
        in_specs=[
            pl.BlockSpec((tb, OBS_DIM), lambda i: (i, 0)),   # x tile moves
            resident(w1), resident(b1),
            resident(w2), resident(b2),
            resident(w3), resident(b3),
        ],
        out_specs=pl.BlockSpec((tb, OUT_PAD), lambda i: (i, 0)),
        compiler_params=pltpu.CompilerParams(
            dimension_semantics=("parallel",)),
    )(x, w1, b1, w2, b2, w3, b3)

    return out[:B, :N_ACT]


def init_qnet_params(key):
    """PyTorch nn.Linear-style init (uniform in +-1/sqrt(fan_in)).

    Returns (kernel_params, ref_params):
      kernel_params: w1/b1 f32, w2/w3 bf16, fc3 padded to 128 cols.
      ref_params:    pure f32, unpadded (for the correctness reference).
    """
    def linear(key, fan_in, fan_out):
        kw, kb = jax.random.split(key)
        bound = 1.0 / jnp.sqrt(float(fan_in))
        w = jax.random.uniform(kw, (fan_in, fan_out), jnp.float32, -bound, bound)
        b = jax.random.uniform(kb, (1, fan_out), jnp.float32, -bound, bound)
        return w, b

    k1, k2, k3 = jax.random.split(key, 3)
    w1, b1 = linear(k1, OBS_DIM, HIDDEN)
    w2, b2 = linear(k2, HIDDEN, HIDDEN)
    w3, b3 = linear(k3, HIDDEN, N_ACT)

    w3p = jnp.zeros((HIDDEN, OUT_PAD), jnp.float32).at[:, :N_ACT].set(w3)
    b3p = jnp.zeros((1, OUT_PAD), jnp.float32).at[:, :N_ACT].set(b3)

    kernel_params = {
        "w1": w1, "b1": b1,
        "w2": w2.astype(jnp.bfloat16), "b2": b2,
        "w3": w3p.astype(jnp.bfloat16), "b3": b3p,
    }
    ref_params = {"w1": w1, "b1": b1, "w2": w2, "b2": b2, "w3": w3, "b3": b3}
    return kernel_params, ref_params


def qnet_reference(x, p):
    h1 = jnp.maximum(x @ p["w1"] + p["b1"], 0.0)
    h2 = jnp.maximum(h1 @ p["w2"] + p["b2"], 0.0)
    return h2 @ p["w3"] + p["b3"]


if __name__ == "__main__":
    key = jax.random.PRNGKey(0)
    kp, kx1, kx2 = jax.random.split(key, 3)

    params, ref_params = init_qnet_params(kp)

    # CartPole observation dim = 4; small batch of 8 observations.
    x = jax.random.normal(kx1, (8, OBS_DIM), jnp.float32)
    out = jax.block_until_ready(qnet_forward(x, params))
    ref = qnet_reference(x, ref_params)
    assert out.shape == (8, N_ACT)
    assert jnp.allclose(out, ref, atol=5e-2, rtol=5e-2), \
        float(jnp.max(jnp.abs(out - ref)))

    # Exercise the batch grid (3 tiles) and padding of a non-multiple batch.
    x2 = jax.random.normal(kx2, (20, OBS_DIM), jnp.float32)
    out2 = jax.block_until_ready(qnet_forward(x2, params, tile_b=8))
    ref2 = qnet_reference(x2, ref_params)
    assert out2.shape == (20, N_ACT)
    assert jnp.allclose(out2, ref2, atol=5e-2, rtol=5e-2), \
        float(jnp.max(jnp.abs(out2 - ref2)))

    print("KERNEL_OK")
</pallas_src>

<mosaic_0001>
module attributes {stable_mosaic.version = 11 : i64} {
  func.func @qnet_kernel(%arg0: i32, %arg1: memref<8x4xf32, #tpu.memory_space<vmem>>, %arg2: memref<4x128xf32, #tpu.memory_space<vmem>>, %arg3: memref<1x128xf32, #tpu.memory_space<vmem>>, %arg4: memref<128x128xbf16, #tpu.memory_space<vmem>>, %arg5: memref<1x128xf32, #tpu.memory_space<vmem>>, %arg6: memref<128x128xbf16, #tpu.memory_space<vmem>>, %arg7: memref<1x128xf32, #tpu.memory_space<vmem>>, %arg8: memref<8x128xf32, #tpu.memory_space<vmem>>) attributes {dimension_semantics = [#tpu.dimension_semantics<parallel>], iteration_bounds = array<i64: 1>, scalar_prefetch = 0 : i64, scratch_operands = 0 : i64, tpu.core_type = #tpu.core_type<tc>, window_params = [{transform_indices = @transform_0, window_bounds = array<i64: 8, 4>}, {pipeline_mode = #tpu.pipeline_mode<synchronous>, transform_indices = @transform_1, window_bounds = array<i64: 4, 128>}, {pipeline_mode = #tpu.pipeline_mode<synchronous>, transform_indices = @transform_2, window_bounds = array<i64: 1, 128>}, {pipeline_mode = #tpu.pipeline_mode<synchronous>, transform_indices = @transform_3, window_bounds = array<i64: 128, 128>}, {pipeline_mode = #tpu.pipeline_mode<synchronous>, transform_indices = @transform_4, window_bounds = array<i64: 1, 128>}, {pipeline_mode = #tpu.pipeline_mode<synchronous>, transform_indices = @transform_5, window_bounds = array<i64: 128, 128>}, {pipeline_mode = #tpu.pipeline_mode<synchronous>, transform_indices = @transform_6, window_bounds = array<i64: 1, 128>}, {transform_indices = @transform_7, window_bounds = array<i64: 8, 128>}]} {
    %c0 = arith.constant 0 : index
    %c0_0 = arith.constant 0 : index
    %0 = vector.load %arg1[%c0, %c0_0] : memref<8x4xf32, #tpu.memory_space<vmem>>, vector<8x4xf32>
    %c0_1 = arith.constant 0 : index
    %c0_2 = arith.constant 0 : index
    %1 = vector.load %arg2[%c0_1, %c0_2] : memref<4x128xf32, #tpu.memory_space<vmem>>, vector<4x128xf32>
    %c0_3 = arith.constant 0 : index
    %c0_4 = arith.constant 0 : index
    %2 = vector.load %arg3[%c0_3, %c0_4] : memref<1x128xf32, #tpu.memory_space<vmem>>, vector<1x128xf32>
    %3 = vector.extract_strided_slice %0 {offsets = [0, 0], sizes = [8, 1], strides = [1, 1]} : vector<8x4xf32> to vector<8x1xf32>
    %4 = vector.extract_strided_slice %1 {offsets = [0, 0], sizes = [1, 128], strides = [1, 1]} : vector<4x128xf32> to vector<1x128xf32>
    %5 = vector.broadcast %3 : vector<8x1xf32> to vector<8x128xf32>
    %6 = vector.broadcast %4 : vector<1x128xf32> to vector<8x128xf32>
    %7 = arith.mulf %5, %6 : vector<8x128xf32>
    %8 = vector.broadcast %2 : vector<1x128xf32> to vector<8x128xf32>
    %9 = arith.addf %8, %7 : vector<8x128xf32>
    %10 = vector.extract_strided_slice %0 {offsets = [0, 1], sizes = [8, 1], strides = [1, 1]} : vector<8x4xf32> to vector<8x1xf32>
    %11 = vector.extract_strided_slice %1 {offsets = [1, 0], sizes = [1, 128], strides = [1, 1]} : vector<4x128xf32> to vector<1x128xf32>
    %12 = vector.broadcast %10 : vector<8x1xf32> to vector<8x128xf32>
    %13 = vector.broadcast %11 : vector<1x128xf32> to vector<8x128xf32>
    %14 = arith.mulf %12, %13 : vector<8x128xf32>
    %15 = arith.addf %9, %14 : vector<8x128xf32>
    %16 = vector.extract_strided_slice %0 {offsets = [0, 2], sizes = [8, 1], strides = [1, 1]} : vector<8x4xf32> to vector<8x1xf32>
    %17 = vector.extract_strided_slice %1 {offsets = [2, 0], sizes = [1, 128], strides = [1, 1]} : vector<4x128xf32> to vector<1x128xf32>
    %18 = vector.broadcast %16 : vector<8x1xf32> to vector<8x128xf32>
    %19 = vector.broadcast %17 : vector<1x128xf32> to vector<8x128xf32>
    %20 = arith.mulf %18, %19 : vector<8x128xf32>
    %21 = arith.addf %15, %20 : vector<8x128xf32>
    %22 = vector.extract_strided_slice %0 {offsets = [0, 3], sizes = [8, 1], strides = [1, 1]} : vector<8x4xf32> to vector<8x1xf32>
    %23 = vector.extract_strided_slice %1 {offsets = [3, 0], sizes = [1, 128], strides = [1, 1]} : vector<4x128xf32> to vector<1x128xf32>
    %24 = vector.broadcast %22 : vector<8x1xf32> to vector<8x128xf32>
    %25 = vector.broadcast %23 : vector<1x128xf32> to vector<8x128xf32>
    %26 = arith.mulf %24, %25 : vector<8x128xf32>
    %27 = arith.addf %21, %26 : vector<8x128xf32>
    %cst = arith.constant 0.000000e+00 : f32
    %28 = vector.broadcast %cst : f32 to vector<8x128xf32>
    %29 = arith.maximumf %27, %28 : vector<8x128xf32>
    %30 = arith.truncf %29 : vector<8x128xf32> to vector<8x128xbf16>
    %c0_5 = arith.constant 0 : index
    %c0_6 = arith.constant 0 : index
    %31 = vector.load %arg4[%c0_5, %c0_6] : memref<128x128xbf16, #tpu.memory_space<vmem>>, vector<128x128xbf16>
    %cst_7 = arith.constant dense<0.000000e+00> : vector<8x128xf32>
    %32 = tpu.matmul %30, %31, %cst_7 {dimension_numbers = #tpu.dot_dimension_numbers<[1], [0], [0], [1], [0, 0, 1, 1], [], []>} : vector<8x128xbf16>, vector<128x128xbf16>, vector<8x128xf32> -> vector<8x128xf32>
    %c0_8 = arith.constant 0 : index
    %c0_9 = arith.constant 0 : index
    %33 = vector.load %arg5[%c0_8, %c0_9] : memref<1x128xf32, #tpu.memory_space<vmem>>, vector<1x128xf32>
    %34 = vector.broadcast %33 : vector<1x128xf32> to vector<8x128xf32>
    %35 = arith.addf %32, %34 : vector<8x128xf32>
    %cst_10 = arith.constant 0.000000e+00 : f32
    %36 = vector.broadcast %cst_10 : f32 to vector<8x128xf32>
    %37 = arith.maximumf %35, %36 : vector<8x128xf32>
    %38 = arith.truncf %37 : vector<8x128xf32> to vector<8x128xbf16>
    %c0_11 = arith.constant 0 : index
    %c0_12 = arith.constant 0 : index
    %39 = vector.load %arg6[%c0_11, %c0_12] : memref<128x128xbf16, #tpu.memory_space<vmem>>, vector<128x128xbf16>
    %cst_13 = arith.constant dense<0.000000e+00> : vector<8x128xf32>
    %40 = tpu.matmul %38, %39, %cst_13 {dimension_numbers = #tpu.dot_dimension_numbers<[1], [0], [0], [1], [0, 0, 1, 1], [], []>} : vector<8x128xbf16>, vector<128x128xbf16>, vector<8x128xf32> -> vector<8x128xf32>
    %c0_14 = arith.constant 0 : index
    %c0_15 = arith.constant 0 : index
    %41 = vector.load %arg7[%c0_14, %c0_15] : memref<1x128xf32, #tpu.memory_space<vmem>>, vector<1x128xf32>
    %42 = vector.broadcast %41 : vector<1x128xf32> to vector<8x128xf32>
    %43 = arith.addf %40, %42 : vector<8x128xf32>
    %c0_16 = arith.constant 0 : index
    %c0_17 = arith.constant 0 : index
    %44 = vector.load %arg8[%c0_16, %c0_17] : memref<8x128xf32, #tpu.memory_space<vmem>>, vector<8x128xf32>
    tpu.vector_store %arg8[%c0_16, %c0_17], %43 {strides = array<i32>} : memref<8x128xf32, #tpu.memory_space<vmem>>, vector<8x128xf32>,
    return
  }
  func.func @transform_0(%arg0: i32) -> (i32, i32) {
    %c0_i32 = arith.constant 0 : i32
    %c0_i32_0 = arith.constant 0 : i32
    return %arg0, %c0_i32 : i32, i32
  }
  func.func @transform_1(%arg0: i32) -> (i32, i32) {
    %c0_i32 = arith.constant 0 : i32
    %c0_i32_0 = arith.constant 0 : i32
    %c0_i32_1 = arith.constant 0 : i32
    return %c0_i32, %c0_i32_0 : i32, i32
  }
  func.func @transform_2(%arg0: i32) -> (i32, i32) {
    %c0_i32 = arith.constant 0 : i32
    %c0_i32_0 = arith.constant 0 : i32
    %c0_i32_1 = arith.constant 0 : i32
    return %c0_i32, %c0_i32_0 : i32, i32
  }
  func.func @transform_3(%arg0: i32) -> (i32, i32) {
    %c0_i32 = arith.constant 0 : i32
    %c0_i32_0 = arith.constant 0 : i32
    %c0_i32_1 = arith.constant 0 : i32
    return %c0_i32, %c0_i32_0 : i32, i32
  }
  func.func @transform_4(%arg0: i32) -> (i32, i32) {
    %c0_i32 = arith.constant 0 : i32
    %c0_i32_0 = arith.constant 0 : i32
    %c0_i32_1 = arith.constant 0 : i32
    return %c0_i32, %c0_i32_0 : i32, i32
  }
  func.func @transform_5(%arg0: i32) -> (i32, i32) {
    %c0_i32 = arith.constant 0 : i32
    %c0_i32_0 = arith.constant 0 : i32
    %c0_i32_1 = arith.constant 0 : i32
    return %c0_i32, %c0_i32_0 : i32, i32
  }
  func.func @transform_6(%arg0: i32) -> (i32, i32) {
    %c0_i32 = arith.constant 0 : i32
    %c0_i32_0 = arith.constant 0 : i32
    %c0_i32_1 = arith.constant 0 : i32
    return %c0_i32, %c0_i32_0 : i32, i32
  }
  func.func @transform_7(%arg0: i32) -> (i32, i32) {
    %c0_i32 = arith.constant 0 : i32
    %c0_i32_0 = arith.constant 0 : i32
    return %arg0, %c0_i32 : i32, i32
  }
}

</mosaic_0001>

<bundles_post_ra>
// kernel: tpu_custom_call.1
= control target key start
LH: loop header
LB: loop body
LE: loop exit
PB: predicated region body
PF: predicated region fallthrough
CT: control target
= control target key end

     0   :  { %12 = vsyncpa [#allocation3], 0  ;;  %s650_s0 = inlined_call_operand.vmem [shape: f32[8,4], index: 0, kind: input, shape index: {}]   ;;  %s651_s1 = inlined_call_operand.vmem [shape: f32[4,128], index: 1, kind: input, shape index: {}]   ;;  %s652_s2 = inlined_call_operand.vmem [shape: f32[1,128], index: 2, kind: input, shape index: {}]   ;;  %s653_s3 = inlined_call_operand.hbm [shape: bf16[128,128], index: 3, kind: input, shape index: {}]   ;;  %s654_s4 = inlined_call_operand.vmem [shape: f32[1,128], index: 4, kind: input, shape index: {}]   ;;  %s655_s5 = inlined_call_operand.hbm [shape: bf16[128,128], index: 5, kind: input, shape index: {}]   ;;  %s656_s6 = inlined_call_operand.vmem [shape: f32[1,128], index: 6, kind: input, shape index: {}]   ;;  %s657_s7 = inlined_call_operand.hbm [shape: f32[8,128], index: 7, kind: output, shape index: {}]  }
   0x1   :  { %13 = vsyncpa [#allocation6], 0 }
   0x2   :  { %14 = vsyncpa [#allocation4], 0  ;;  %s530_s24 = smov [#allocation2]   ;;  %s458_s28 = scalar_lea.hbm %s653_s3, 1024 }
   0x3   :  { %s26_s25 = sshll.u32 %s530_s24, 4  ;;  %p459_p0 = scmp.ne.s32.totalorder %s653_s3, %s458_s28  ;;  %s27_s25 = int_to_ptr.vmem [resolvable:$true] %s26_s25 }
   0x4   :  { %p462_p1 = scmp.lt.u32.totalorder %s458_s28, %s653_s3 }
   0x6   :  { %p464_p2 = pnand %p462_p1, %p459_p0 }
   0x8   :  { %467 = shalt.err (!%p464_p2)
}
   0x9   :  { %s468_s10 = scalar_lea.vmem %s27_s25, 1024  ;;  %p473_p4 = scmp.lt.s32.totalorder %s27_s25, %s27_s25 }
   0xa   :  { %p469_p3 = scmp.ne.s32.totalorder %s27_s25, %s468_s10  ;;  %p474_p5 = scmp.lt.s32.totalorder %s468_s10, %s468_s10 }
   0xc   :  { %p475_p6 = por %p474_p5, %p473_p4 }
   0xe   :  { %p476_p7 = pnand %p475_p6, %p469_p3 }
  0x10   :  { %479 = shalt.err (!%p476_p7)
}
  0x11   :  { %s531_s11 = smov 64   ;;  %s532_s12 = smov 4  }
  0x12   :  { %32 = dma.hbm_to_vmem [thread:$0]  %s653_s3, 1024, %s27_s25, [#allocation3], %s531_s11, %s531_s11, %s532_s12  }
  0x13   :  { %s533_s15 = smov [#allocation5]   ;;  %s480_s19 = scalar_lea.hbm %s655_s5, 1024 }
  0x14   :  { %s40_s16 = sshll.u32 %s533_s15, 4  ;;  %p481_p8 = scmp.ne.s32.totalorder %s655_s5, %s480_s19  ;;  %s41_s16 = int_to_ptr.vmem [resolvable:$true] %s40_s16 }
  0x15   :  { %p484_p9 = scmp.lt.u32.totalorder %s480_s19, %s655_s5 }
  0x17   :  { %p486_p10 = pnand %p484_p9, %p481_p8 }
  0x19   :  { %489 = shalt.err (!%p486_p10)
}
  0x1a   :  { %s490_s24 = scalar_lea.vmem %s41_s16, 1024  ;;  %p495_p12 = scmp.lt.s32.totalorder %s41_s16, %s41_s16 }
  0x1b   :  { %p491_p11 = scmp.ne.s32.totalorder %s41_s16, %s490_s24  ;;  %p496_p13 = scmp.lt.s32.totalorder %s490_s24, %s490_s24 }
  0x1d   :  { %p497_p0 = por %p496_p13, %p495_p12 }
  0x1f   :  { %p498_p1 = pnand %p497_p0, %p491_p11 }
  0x21   :  { %501 = shalt.err (!%p498_p1)
}
  0x22   :  { %46 = dma.hbm_to_vmem [thread:$0]  %s655_s5, 1024, %s41_s16, [#allocation6], %s531_s11, %s531_s11, %s532_s12  }
  0x23   :  { %524 = dma.done.wait [#allocation3], 1024  }
  0x24   :  { %525 = vsyncadd [#allocation3], 4294966272 }
  0x25   :  { %526 = dma.done.wait [#allocation6], 1024  }
  0x26   :  { %527 = vsyncadd [#allocation6], 4294966272  ;;  %v534_v0 = vmov 0   ;;  %v535_v1 = vmov 2   ;;  %v536_v2 = vmov 0.0   ;;  %v56_v3 = vld [vmem:[%s650_s0] sm:$0xff]  ;;  %v64_v20 = vlaneseq }
  0x27   :  { %437 = vset.pattern.permute.xlu0 %v534_v0  ;;  %439 = vset.pattern.permute.xlu1 %v535_v1  ;;  %v442_v4 = vld [vmem:[#allocation2] sm:$0xff]   ;;  %v443_v5 = vld [vmem:[#allocation2 + $0x8] sm:$0xff]   ;;  %v537_v6 = vmov 1   ;;  %v538_v7 = vmov 3   ;;  %v444_v8 = vld [vmem:[#allocation2 + $0x10] sm:$0xff]   ;;  %vm539_vm0 = vmmov 0  }
  0x28   :  { %386 = vmatprep.subr.bf16.mxu0 %v536_v2  ;;  %406 = vmatprep.subr.bf16.mxu1 %v536_v2  ;;  %v445_v9 = vld [vmem:[#allocation2 + $0x18] sm:$0xff]   ;;  %v446_v10 = vld [vmem:[#allocation2 + $0x20] sm:$0xff]   ;;  %v447_v12 = vld [vmem:[#allocation2 + $0x28] sm:$0xff]   ;;  %v65_v21 = vshrl.u32 %v64_v20, 7  ;;  %s540_s9 = smov [#allocation7]  }
  0x29   :  { %61 = vperm.xlu0 %437, %v56_v3   ;;  %87 = vperm.xlu1 %439, %v56_v3   ;;  %v450_v11 = vld [vmem:[#allocation5] sm:$0xff]   ;;  %v451_v13 = vld [vmem:[#allocation5 + $0x8] sm:$0xff]   ;;  %v448_v14 = vld [vmem:[#allocation2 + $0x30] sm:$0xff]   ;;  %s339_s10 = sshll.u32 %s540_s9, 4  ;;  %s340_s10 = int_to_ptr.vmem [resolvable:$true] %s339_s10 }
  0x2a   :  { %387 = vmatpush3.bf16.msra.mxu0 %v442_v4  ;;  %402 = vmatprep.mubr.msk.bf16.mxu0 %vm539_vm0, %v536_v2  ;;  %v452_v15 = vld [vmem:[#allocation5 + $0x10] sm:$0xff]   ;;  %v449_v16 = vld [vmem:[#allocation2 + $0x38] sm:$0xff]   ;;  %v454_v18 = vld [vmem:[#allocation5 + $0x20] sm:$0xff]   ;;  %v66_v22 = vsub.s32 0, %v65_v21  ;;  %v82_v25 = vsub.s32 1, %v65_v21  ;;  %v92_v27 = vsub.s32 2, %v65_v21  ;;  %p507_p3 = scmp.lt.s32.totalorder %s340_s10, %s340_s10 }
  0x2b   :  { %388 = vmatprep.subr.bf16.mxu0 %v536_v2  ;;  %422 = vmatprep.mubr.msk.bf16.mxu1 %vm539_vm0, %v536_v2  ;;  %v453_v17 = vld [vmem:[#allocation5 + $0x18] sm:$0xff]   ;;  %v455_v19 = vld [vmem:[#allocation5 + $0x28] sm:$0xff]   ;;  %v57_v23 = vld [vmem:[%s651_s1] sm:$0xf]  ;;  %v102_v29 = vsub.s32 3, %v65_v21 }
  0x2c   :  { %407 = vmatpush3.bf16.msra.mxu1 %v450_v11  ;;  %v67_v24 = vrot.slane %v57_v23, %v66_v22  ;;  %v83_v31 = vrot.slane %v57_v23, %v82_v25  ;;  %v349_v32 = vld [vmem:[%s652_s2] ss:$0 sm:$0xff]  ;;  %v93_v33 = vrot.slane %v57_v23, %v92_v27  ;;  %v456_v46 = vld [vmem:[#allocation5 + $0x30] sm:$0xff]   ;;  %v457_v47 = vld [vmem:[#allocation5 + $0x38] sm:$0xff]  }
  0x2d   :  { %438 = vset.pattern.permute.xlu0 %v537_v6  ;;  %440 = vset.pattern.permute.xlu1 %v538_v7  ;;  %v103_v34 = vrot.slane %v57_v23, %v102_v29  ;;  %v350_v48 = vld [vmem:[%s654_s4] ss:$0 sm:$0xff]  ;;  %s502_s4 = scalar_lea.vmem %s340_s10, 128 }
  0x2e   :  { %77 = vperm.xlu0 %438, %v56_v3   ;;  %97 = vperm.xlu1 %440, %v56_v3   ;;  %v359_v56 = vld [vmem:[%s656_s6] ss:$0 sm:$0xff]  ;;  %p503_p2 = scmp.ne.s32.totalorder %s340_s10, %s502_s4  ;;  %p508_p4 = scmp.lt.s32.totalorder %s502_s4, %s502_s4 }
  0x2f   :  { %389 = vmatpush3.bf16.msra.mxu0 %v443_v5  ;;  %408 = vmatprep.subr.bf16.mxu1 %v536_v2 }
  0x30   :  { %390 = vmatprep.subr.bf16.mxu0 %v536_v2  ;;  %409 = vmatpush3.bf16.msra.mxu1 %v451_v13  ;;  %p509_p5 = por %p508_p4, %p507_p3 }
  0x31   :  { %410 = vmatprep.subr.bf16.mxu1 %v536_v2 }
  0x32   :  { %441 = vset.pattern.permute.xlu0 %v538_v7  ;;  %p510_p6 = pnand %p509_p5, %p503_p2 }
  0x33   :  { %391 = vmatpush3.bf16.msra.mxu0 %v444_v8 }
  0x34   :  { %392 = vmatprep.subr.bf16.mxu0 %v536_v2  ;;  %411 = vmatpush3.bf16.msra.mxu1 %v452_v15 }
  0x35   :  { %412 = vmatprep.subr.bf16.mxu1 %v536_v2 }
  0x37   :  { %393 = vmatpush3.bf16.msra.mxu0 %v445_v9 }
  0x38   :  { %394 = vmatprep.subr.bf16.mxu0 %v536_v2  ;;  %413 = vmatpush3.bf16.msra.mxu1 %v453_v17 }
  0x39   :  { %414 = vmatprep.subr.bf16.mxu1 %v536_v2 }
  0x3b   :  { %395 = vmatpush3.bf16.msra.mxu0 %v446_v10 }
  0x3c   :  { %396 = vmatprep.subr.bf16.mxu0 %v536_v2  ;;  %415 = vmatpush3.bf16.msra.mxu1 %v454_v18 }
  0x3d   :  { %416 = vmatprep.subr.bf16.mxu1 %v536_v2 }
  0x3f   :  { %397 = vmatpush3.bf16.msra.mxu0 %v447_v12 }
  0x40   :  { %398 = vmatprep.subr.bf16.mxu0 %v536_v2  ;;  %417 = vmatpush3.bf16.msra.mxu1 %v455_v19 }
  0x41   :  { %418 = vmatprep.subr.bf16.mxu1 %v536_v2 }
  0x43   :  { %399 = vmatpush3.bf16.msra.mxu0 %v448_v14 }
  0x44   :  { %400 = vmatprep.subr.bf16.mxu0 %v536_v2  ;;  %419 = vmatpush3.bf16.msra.mxu1 %v456_v46 }
  0x45   :  { %420 = vmatprep.subr.bf16.mxu1 %v536_v2 }
  0x47   :  { %401 = vmatpush3.bf16.msra.mxu0 %v449_v16 }
  0x48   :  { %421 = vmatpush3.bf16.msra.mxu1 %v457_v47 }
  0xa8   :  { %v62_v26 = vpop.permute.xlu0 %61  ;;  %v88_v28 = vpop.permute.xlu1 %87 }
  0xa9   :  { %v68_v30 = vmul.f32 %v67_v24, %v62_v26  ;;  %v94_v39 = vmul.f32 %v93_v33, %v88_v28 }
  0xab   :  { %v75_v37 = vadd.f32 %v349_v32, %v68_v30 }
  0xad   :  { %v78_v35 = vpop.permute.xlu0 %77  ;;  %v98_v36 = vpop.permute.xlu1 %97 }
  0xae   :  { %v84_v38 = vmul.f32 %v83_v31, %v78_v35  ;;  %v104_v41 = vmul.f32 %v103_v34, %v98_v36 }
  0xb0   :  { %v85_v40 = vadd.f32 %v84_v38, %v75_v37 }
  0xb2   :  { %v95_v42 = vadd.f32 %v94_v39, %v85_v40 }
  0xb4   :  { %v105_v43 = vadd.f32 %v104_v41, %v95_v42 }
  0xb6   :  { %v106_v44 = vmax.f32 %v105_v43, 0.0 }
  0xb8   :  { %v107_v45 = vpack.c.bf16 %v106_v44, %v106_v44 }
  0xba   :  { %403 = vmatmul.mubr.bf16.vlgmr.msra.gmra.mrb[0].mxu0 %v107_v45 }
 0x18d   :  { %v213_v49 = vpop.f32.mrb[0].mxu0 }
 0x18e   :  { %v214_v50 = vadd.f32 %v350_v48, %v213_v49  ;;  %v404_v51 = vpop.f32.mrb[1].mxu0 }
 0x18f   :  { %v216_v52 = vpop.f32.mrb[2].mxu0 }
 0x190   :  { %v219_v53 = vmax.f32 %v214_v50, 0.0  ;;  %v405_v54 = vpop.f32.mrb[3].mxu0 }
 0x192   :  { %v220_v55 = vpack.c.bf16 %v219_v53, %v219_v53 }
 0x194   :  { %423 = vmatmul.mubr.bf16.vlgmr.msra.gmra.mrb[0].mxu1 %v220_v55 }
 0x267   :  { %v326_v57 = vpop.f32.mrb[0].mxu1 }
 0x268   :  { %v327_v58 = vadd.f32 %v359_v56, %v326_v57  ;;  %v424_v59 = vpop.f32.mrb[1].mxu1 }
 0x269   :  { %v329_v60 = vpop.f32.mrb[2].mxu1 }
 0x26a   :  { %332 = vst [vmem:[#allocation7] sm:$0xff] %v327_v58  ;;  %v425_v61 = vpop.f32.mrb[3].mxu1 }
 0x26b   :  { %513 = shalt.err (!%p510_p6)
}
 0x26c   :  { %s514_s6 = scalar_lea.hbm %s657_s7, 128 }
 0x26d   :  { %p515_p7 = scmp.ne.s32.totalorder %s657_s7, %s514_s6  ;;  %p518_p8 = scmp.lt.u32.totalorder %s514_s6, %s657_s7 }
 0x26f   :  { %p520_p9 = pnand %p518_p8, %p515_p7 }
 0x271   :  { %523 = shalt.err (!%p520_p9)
}
 0x272   :  { %342 = dma.vmem_to_hbm [thread:$0]  %s340_s10, 128, %s657_s7, [#allocation4]  }
 0x273   :  { %528 = dma.done.wait [#allocation4], 128  }
 0x274   :  { %529 = vsyncadd [#allocation4], 4294967168 }
 0x275   :  { %346 = vsyncpa [#allocation3], 1 }
 0x276   :  { %347 = vsyncpa [#allocation6], 1 }
 0x277   :  { %348 = vsyncpa [#allocation4], 1 }

</bundles_post_ra>
